<compile_context>
chip_gen: v7x
topology: tpu7x:2x2x1
jax: 0.10.0
libtpu: 0.0.40
codegen_flags: <defaults>
</compile_context>

<pallas_src>
import math

import jax
import jax.numpy as jnp
import numpy as np
from jax import lax
from jax.experimental import pallas as pl
from jax.experimental.pallas import tpu as pltpu


_TAPS = tuple((dy, dx) for dy in range(3) for dx in range(3))


def _build_slab(act, masks, W):
    """act: (C, H*W) f32.  masks: (9, H*W) f32 0/1 edge-validity masks.

    Returns the im2col slab (9*C, H*W): for tap (dy, dx) at flat position
    p = y*W + x the slab holds act[c, (y+dy-1)*W + (x+dx-1)] when that pixel is
    inside the image and 0 otherwise (== SAME zero padding for a 3x3 conv).
    """
    taps = []
    for k, (dy, dx) in enumerate(_TAPS):
        off = (dy - 1) * W + (dx - 1)
        # roll brings act[p + off] to position p; the mask kills wrap-around /
        # out-of-image pixels.  (Static shift -> lane slices + concat.)
        t = act if off == 0 else jnp.roll(act, -off, axis=1)
        if not (dy == 1 and dx == 1):
            t = t * masks[k:k + 1, :]
        taps.append(t)
    return jnp.concatenate(taps, axis=0)  # (9*C, H*W)


def _make_kernel(H, W):
    def resblock_kernel(x_ref, m_ref, w1_ref, b1_ref, w2_ref, b2_ref, out_ref):
        # x_ref  : (C, H*W)  f32   one image, lane-dense
        # m_ref  : (9, H*W)  f32   0/1 edge masks, one per 3x3 tap
        # w*_ref : (C, 9*C)  bf16  Cout x (ky, kx, Cin) matrix
        # b*_ref : (C, 1)    f32
        # out_ref: (C, H*W)
        xf = x_ref[...].astype(jnp.float32)
        masks = m_ref[...]

        # conv1: single im2col matmul with K = 9*Cin, bias + ReLU in f32.
        slab1 = _build_slab(xf, masks, W).astype(jnp.bfloat16)
        h1 = jnp.dot(w1_ref[...], slab1, preferred_element_type=jnp.float32)
        h1 = jnp.maximum(h1 + b1_ref[...], 0.0)

        # conv2 directly on the in-register ReLU output (no VMEM scratch).
        slab2 = _build_slab(h1, masks, W).astype(jnp.bfloat16)
        h2 = jnp.dot(w2_ref[...], slab2, preferred_element_type=jnp.float32)
        h2 = h2 + b2_ref[...]

        # residual add; dense 128-lane store.
        out_ref[...] = (xf + h2).astype(out_ref.dtype)

    return resblock_kernel


def residual_block_nobn(x_nchw, w1, b1, w2, b2):
    """x_nchw: (N, C, H, W) float32.  w*: (C, C, 3, 3), b*: (C,)."""
    N, C, H, W = x_nchw.shape
    HW = H * W

    # (N, C, H, W) -> (N, C, H*W): row-major flatten, no data movement.
    x2d = x_nchw.reshape(N, C, HW)

    # (Cout, Cin, kH, kW) -> (Cout, kH*kW*Cin), matching the slab's
    # (tap-major, channel-minor) contraction order; bf16 for the MXU.
    w1m = jnp.transpose(w1, (0, 2, 3, 1)).reshape(C, 9 * C).astype(jnp.bfloat16)
    w2m = jnp.transpose(w2, (0, 2, 3, 1)).reshape(C, 9 * C).astype(jnp.bfloat16)
    b1m = b1.reshape(C, 1).astype(jnp.float32)
    b2m = b2.reshape(C, 1).astype(jnp.float32)

    # Precompute the 9 edge-validity masks once (hoisted out of the kernel).
    rows = jnp.arange(HW, dtype=jnp.int32) // W
    cols = jnp.arange(HW, dtype=jnp.int32) % W
    mask_list = []
    for dy, dx in _TAPS:
        m = jnp.ones((HW,), jnp.float32)
        if dy == 0:
            m = m * (rows >= 1)
        elif dy == 2:
            m = m * (rows <= H - 2)
        if dx == 0:
            m = m * (cols >= 1)
        elif dx == 2:
            m = m * (cols <= W - 2)
        mask_list.append(m)
    masks = jnp.stack(mask_list, axis=0)  # (9, HW) f32

    # TODO(synk): for production sizes (nf=64, frames >= 256x256) add spatial
    # row tiling (grid=(N, H//TH) with a 1-row halo) so the per-step VMEM
    # footprint stays well under v7x's 64 MiB and the pipeline has more steps.
    out2d = pl.pallas_call(
        _make_kernel(H, W),
        out_shape=jax.ShapeDtypeStruct((N, C, HW), x_nchw.dtype),
        grid_spec=pltpu.PrefetchScalarGridSpec(
            num_scalar_prefetch=0,
            grid=(N,),
            in_specs=[
                pl.BlockSpec((None, C, HW), lambda n: (n, 0, 0)),
                pl.BlockSpec((9, HW), lambda n: (0, 0)),
                pl.BlockSpec((C, 9 * C), lambda n: (0, 0)),
                pl.BlockSpec((C, 1), lambda n: (0, 0)),
                pl.BlockSpec((C, 9 * C), lambda n: (0, 0)),
                pl.BlockSpec((C, 1), lambda n: (0, 0)),
            ],
            out_specs=pl.BlockSpec((None, C, HW), lambda n: (n, 0, 0)),
        ),
        compiler_params=pltpu.CompilerParams(
            dimension_semantics=("parallel",)),
    )(x2d, masks, w1m, b1m, w2m, b2m)

    return out2d.reshape(N, C, H, W)


def _reference(x, w1, b1, w2, b2):
    """Pure-JAX NCHW f32 reference (mirrors the PyTorch forward)."""
    dn = lax.conv_dimension_numbers(x.shape, w1.shape, ("NCHW", "OIHW", "NCHW"))
    c1 = lax.conv_general_dilated(x, w1, (1, 1), ((1, 1), (1, 1)), dimension_numbers=dn)
    c1 = jnp.maximum(c1 + b1[None, :, None, None], 0.0)
    c2 = lax.conv_general_dilated(c1, w2, (1, 1), ((1, 1), (1, 1)), dimension_numbers=dn)
    c2 = c2 + b2[None, :, None, None]
    return x + c2


if __name__ == "__main__":
    N, nf, H, W = 2, 8, 16, 16

    key = jax.random.PRNGKey(0)
    kx, k1, k2 = jax.random.split(key, 3)

    # Deterministic init matching initialize_weights(..., scale=0.1):
    # kaiming_normal_(a=0, mode='fan_in') -> std = sqrt(2 / (Cin*kH*kW)), *0.1; bias = 0.
    fan_in = nf * 3 * 3
    std = math.sqrt(2.0 / fan_in)
    w1 = jax.random.normal(k1, (nf, nf, 3, 3), jnp.float32) * std * 0.1
    w2 = jax.random.normal(k2, (nf, nf, 3, 3), jnp.float32) * std * 0.1
    b1 = jnp.zeros((nf,), jnp.float32)
    b2 = jnp.zeros((nf,), jnp.float32)

    x = jax.random.normal(kx, (N, nf, H, W), jnp.float32)

    out = jax.block_until_ready(residual_block_nobn(x, w1, b1, w2, b2))
    ref = jax.block_until_ready(_reference(x, w1, b1, w2, b2))

    assert out.shape == (N, nf, H, W)
    # bf16 MXU operands with f32 accumulation -> slightly looser tolerance than pure f32.
    assert np.allclose(np.asarray(out), np.asarray(ref), atol=1e-2, rtol=1e-2)

    print("KERNEL_OK")
</pallas_src>

<mosaic_0001>
module attributes {stable_mosaic.version = 11 : i64} {
  func.func @resblock_kernel(%arg0: i32, %arg1: memref<1x8x256xf32, #tpu.memory_space<vmem>>, %arg2: memref<9x256xf32, #tpu.memory_space<vmem>>, %arg3: memref<8x72xbf16, #tpu.memory_space<vmem>>, %arg4: memref<8x1xf32, #tpu.memory_space<vmem>>, %arg5: memref<8x72xbf16, #tpu.memory_space<vmem>>, %arg6: memref<8x1xf32, #tpu.memory_space<vmem>>, %arg7: memref<1x8x256xf32, #tpu.memory_space<vmem>>) attributes {dimension_semantics = [#tpu.dimension_semantics<parallel>], iteration_bounds = array<i64: 2>, scalar_prefetch = 0 : i64, scratch_operands = 0 : i64, tpu.core_type = #tpu.core_type<tc>, window_params = [{transform_indices = @transform_0, window_bounds = array<i64: 1, 8, 256>}, {pipeline_mode = #tpu.pipeline_mode<synchronous>, transform_indices = @transform_1, window_bounds = array<i64: 9, 256>}, {pipeline_mode = #tpu.pipeline_mode<synchronous>, transform_indices = @transform_2, window_bounds = array<i64: 8, 72>}, {pipeline_mode = #tpu.pipeline_mode<synchronous>, transform_indices = @transform_3, window_bounds = array<i64: 8, 1>}, {pipeline_mode = #tpu.pipeline_mode<synchronous>, transform_indices = @transform_4, window_bounds = array<i64: 8, 72>}, {pipeline_mode = #tpu.pipeline_mode<synchronous>, transform_indices = @transform_5, window_bounds = array<i64: 8, 1>}, {transform_indices = @transform_6, window_bounds = array<i64: 1, 8, 256>}]} {
    %c0 = arith.constant 0 : index
    %c0_0 = arith.constant 0 : index
    %c0_1 = arith.constant 0 : index
    %0 = vector.load %arg1[%c0, %c0_0, %c0_1] : memref<1x8x256xf32, #tpu.memory_space<vmem>>, vector<1x8x256xf32>
    %1 = vector.shape_cast %0 : vector<1x8x256xf32> to vector<8x256xf32>
    %c0_2 = arith.constant 0 : index
    %c0_3 = arith.constant 0 : index
    %2 = vector.load %arg2[%c0_2, %c0_3] : memref<9x256xf32, #tpu.memory_space<vmem>>, vector<9x256xf32>
    %3 = vector.extract_strided_slice %1 {offsets = [0, 239], sizes = [8, 17], strides = [1, 1]} : vector<8x256xf32> to vector<8x17xf32>
    %4 = vector.extract_strided_slice %1 {offsets = [0, 0], sizes = [8, 239], strides = [1, 1]} : vector<8x256xf32> to vector<8x239xf32>
    %5 = tpu.concatenate %3, %4 in 1 : vector<8x17xf32>, vector<8x239xf32> -> vector<8x256xf32>
    %6 = vector.extract_strided_slice %2 {offsets = [0, 0], sizes = [1, 256], strides = [1, 1]} : vector<9x256xf32> to vector<1x256xf32>
    %7 = vector.broadcast %6 : vector<1x256xf32> to vector<8x256xf32>
    %8 = arith.mulf %5, %7 : vector<8x256xf32>
    %9 = vector.extract_strided_slice %1 {offsets = [0, 240], sizes = [8, 16], strides = [1, 1]} : vector<8x256xf32> to vector<8x16xf32>
    %10 = vector.extract_strided_slice %1 {offsets = [0, 0], sizes = [8, 240], strides = [1, 1]} : vector<8x256xf32> to vector<8x240xf32>
    %11 = tpu.concatenate %9, %10 in 1 : vector<8x16xf32>, vector<8x240xf32> -> vector<8x256xf32>
    %12 = vector.extract_strided_slice %2 {offsets = [1, 0], sizes = [1, 256], strides = [1, 1]} : vector<9x256xf32> to vector<1x256xf32>
    %13 = vector.broadcast %12 : vector<1x256xf32> to vector<8x256xf32>
    %14 = arith.mulf %11, %13 : vector<8x256xf32>
    %15 = vector.extract_strided_slice %1 {offsets = [0, 241], sizes = [8, 15], strides = [1, 1]} : vector<8x256xf32> to vector<8x15xf32>
    %16 = vector.extract_strided_slice %1 {offsets = [0, 0], sizes = [8, 241], strides = [1, 1]} : vector<8x256xf32> to vector<8x241xf32>
    %17 = tpu.concatenate %15, %16 in 1 : vector<8x15xf32>, vector<8x241xf32> -> vector<8x256xf32>
    %18 = vector.extract_strided_slice %2 {offsets = [2, 0], sizes = [1, 256], strides = [1, 1]} : vector<9x256xf32> to vector<1x256xf32>
    %19 = vector.broadcast %18 : vector<1x256xf32> to vector<8x256xf32>
    %20 = arith.mulf %17, %19 : vector<8x256xf32>
    %21 = vector.extract_strided_slice %1 {offsets = [0, 255], sizes = [8, 1], strides = [1, 1]} : vector<8x256xf32> to vector<8x1xf32>
    %22 = vector.extract_strided_slice %1 {offsets = [0, 0], sizes = [8, 255], strides = [1, 1]} : vector<8x256xf32> to vector<8x255xf32>
    %23 = tpu.concatenate %21, %22 in 1 : vector<8x1xf32>, vector<8x255xf32> -> vector<8x256xf32>
    %24 = vector.extract_strided_slice %2 {offsets = [3, 0], sizes = [1, 256], strides = [1, 1]} : vector<9x256xf32> to vector<1x256xf32>
    %25 = vector.broadcast %24 : vector<1x256xf32> to vector<8x256xf32>
    %26 = arith.mulf %23, %25 : vector<8x256xf32>
    %27 = vector.extract_strided_slice %1 {offsets = [0, 1], sizes = [8, 255], strides = [1, 1]} : vector<8x256xf32> to vector<8x255xf32>
    %28 = vector.extract_strided_slice %1 {offsets = [0, 0], sizes = [8, 1], strides = [1, 1]} : vector<8x256xf32> to vector<8x1xf32>
    %29 = tpu.concatenate %27, %28 in 1 : vector<8x255xf32>, vector<8x1xf32> -> vector<8x256xf32>
    %30 = vector.extract_strided_slice %2 {offsets = [5, 0], sizes = [1, 256], strides = [1, 1]} : vector<9x256xf32> to vector<1x256xf32>
    %31 = vector.broadcast %30 : vector<1x256xf32> to vector<8x256xf32>
    %32 = arith.mulf %29, %31 : vector<8x256xf32>
    %33 = vector.extract_strided_slice %1 {offsets = [0, 15], sizes = [8, 241], strides = [1, 1]} : vector<8x256xf32> to vector<8x241xf32>
    %34 = vector.extract_strided_slice %1 {offsets = [0, 0], sizes = [8, 15], strides = [1, 1]} : vector<8x256xf32> to vector<8x15xf32>
    %35 = tpu.concatenate %33, %34 in 1 : vector<8x241xf32>, vector<8x15xf32> -> vector<8x256xf32>
    %36 = vector.extract_strided_slice %2 {offsets = [6, 0], sizes = [1, 256], strides = [1, 1]} : vector<9x256xf32> to vector<1x256xf32>
    %37 = vector.broadcast %36 : vector<1x256xf32> to vector<8x256xf32>
    %38 = arith.mulf %35, %37 : vector<8x256xf32>
    %39 = vector.extract_strided_slice %1 {offsets = [0, 16], sizes = [8, 240], strides = [1, 1]} : vector<8x256xf32> to vector<8x240xf32>
    %40 = vector.extract_strided_slice %1 {offsets = [0, 0], sizes = [8, 16], strides = [1, 1]} : vector<8x256xf32> to vector<8x16xf32>
    %41 = tpu.concatenate %39, %40 in 1 : vector<8x240xf32>, vector<8x16xf32> -> vector<8x256xf32>
    %42 = vector.extract_strided_slice %2 {offsets = [7, 0], sizes = [1, 256], strides = [1, 1]} : vector<9x256xf32> to vector<1x256xf32>
    %43 = vector.broadcast %42 : vector<1x256xf32> to vector<8x256xf32>
    %44 = arith.mulf %41, %43 : vector<8x256xf32>
    %45 = vector.extract_strided_slice %1 {offsets = [0, 17], sizes = [8, 239], strides = [1, 1]} : vector<8x256xf32> to vector<8x239xf32>
    %46 = vector.extract_strided_slice %1 {offsets = [0, 0], sizes = [8, 17], strides = [1, 1]} : vector<8x256xf32> to vector<8x17xf32>
    %47 = tpu.concatenate %45, %46 in 1 : vector<8x239xf32>, vector<8x17xf32> -> vector<8x256xf32>
    %48 = vector.extract_strided_slice %2 {offsets = [8, 0], sizes = [1, 256], strides = [1, 1]} : vector<9x256xf32> to vector<1x256xf32>
    %49 = vector.broadcast %48 : vector<1x256xf32> to vector<8x256xf32>
    %50 = arith.mulf %47, %49 : vector<8x256xf32>
    %51 = tpu.concatenate %8, %14, %20, %26, %1, %32, %38, %44, %50 in 0 : vector<8x256xf32>, vector<8x256xf32>, vector<8x256xf32>, vector<8x256xf32>, vector<8x256xf32>, vector<8x256xf32>, vector<8x256xf32>, vector<8x256xf32>, vector<8x256xf32> -> vector<72x256xf32>
    %52 = arith.truncf %51 : vector<72x256xf32> to vector<72x256xbf16>
    %c0_4 = arith.constant 0 : index
    %c0_5 = arith.constant 0 : index
    %53 = vector.load %arg3[%c0_4, %c0_5] : memref<8x72xbf16, #tpu.memory_space<vmem>>, vector<8x72xbf16>
    %cst = arith.constant dense<0.000000e+00> : vector<8x256xf32>
    %54 = tpu.matmul %53, %52, %cst {dimension_numbers = #tpu.dot_dimension_numbers<[1], [0], [0], [1], [0, 0, 1, 1], [], []>} : vector<8x72xbf16>, vector<72x256xbf16>, vector<8x256xf32> -> vector<8x256xf32>
    %c0_6 = arith.constant 0 : index
    %c0_7 = arith.constant 0 : index
    %55 = vector.load %arg4[%c0_6, %c0_7] : memref<8x1xf32, #tpu.memory_space<vmem>>, vector<8x1xf32>
    %56 = vector.broadcast %55 : vector<8x1xf32> to vector<8x256xf32>
    %57 = arith.addf %54, %56 : vector<8x256xf32>
    %cst_8 = arith.constant 0.000000e+00 : f32
    %58 = vector.broadcast %cst_8 : f32 to vector<8x256xf32>
    %59 = arith.maximumf %57, %58 : vector<8x256xf32>
    %60 = vector.extract_strided_slice %59 {offsets = [0, 239], sizes = [8, 17], strides = [1, 1]} : vector<8x256xf32> to vector<8x17xf32>
    %61 = vector.extract_strided_slice %59 {offsets = [0, 0], sizes = [8, 239], strides = [1, 1]} : vector<8x256xf32> to vector<8x239xf32>
    %62 = tpu.concatenate %60, %61 in 1 : vector<8x17xf32>, vector<8x239xf32> -> vector<8x256xf32>
    %63 = vector.extract_strided_slice %2 {offsets = [0, 0], sizes = [1, 256], strides = [1, 1]} : vector<9x256xf32> to vector<1x256xf32>
    %64 = vector.broadcast %63 : vector<1x256xf32> to vector<8x256xf32>
    %65 = arith.mulf %62, %64 : vector<8x256xf32>
    %66 = vector.extract_strided_slice %59 {offsets = [0, 240], sizes = [8, 16], strides = [1, 1]} : vector<8x256xf32> to vector<8x16xf32>
    %67 = vector.extract_strided_slice %59 {offsets = [0, 0], sizes = [8, 240], strides = [1, 1]} : vector<8x256xf32> to vector<8x240xf32>
    %68 = tpu.concatenate %66, %67 in 1 : vector<8x16xf32>, vector<8x240xf32> -> vector<8x256xf32>
    %69 = vector.extract_strided_slice %2 {offsets = [1, 0], sizes = [1, 256], strides = [1, 1]} : vector<9x256xf32> to vector<1x256xf32>
    %70 = vector.broadcast %69 : vector<1x256xf32> to vector<8x256xf32>
    %71 = arith.mulf %68, %70 : vector<8x256xf32>
    %72 = vector.extract_strided_slice %59 {offsets = [0, 241], sizes = [8, 15], strides = [1, 1]} : vector<8x256xf32> to vector<8x15xf32>
    %73 = vector.extract_strided_slice %59 {offsets = [0, 0], sizes = [8, 241], strides = [1, 1]} : vector<8x256xf32> to vector<8x241xf32>
    %74 = tpu.concatenate %72, %73 in 1 : vector<8x15xf32>, vector<8x241xf32> -> vector<8x256xf32>
    %75 = vector.extract_strided_slice %2 {offsets = [2, 0], sizes = [1, 256], strides = [1, 1]} : vector<9x256xf32> to vector<1x256xf32>
    %76 = vector.broadcast %75 : vector<1x256xf32> to vector<8x256xf32>
    %77 = arith.mulf %74, %76 : vector<8x256xf32>
    %78 = vector.extract_strided_slice %59 {offsets = [0, 255], sizes = [8, 1], strides = [1, 1]} : vector<8x256xf32> to vector<8x1xf32>
    %79 = vector.extract_strided_slice %59 {offsets = [0, 0], sizes = [8, 255], strides = [1, 1]} : vector<8x256xf32> to vector<8x255xf32>
    %80 = tpu.concatenate %78, %79 in 1 : vector<8x1xf32>, vector<8x255xf32> -> vector<8x256xf32>
    %81 = vector.extract_strided_slice %2 {offsets = [3, 0], sizes = [1, 256], strides = [1, 1]} : vector<9x256xf32> to vector<1x256xf32>
    %82 = vector.broadcast %81 : vector<1x256xf32> to vector<8x256xf32>
    %83 = arith.mulf %80, %82 : vector<8x256xf32>
    %84 = vector.extract_strided_slice %59 {offsets = [0, 1], sizes = [8, 255], strides = [1, 1]} : vector<8x256xf32> to vector<8x255xf32>
    %85 = vector.extract_strided_slice %59 {offsets = [0, 0], sizes = [8, 1], strides = [1, 1]} : vector<8x256xf32> to vector<8x1xf32>
    %86 = tpu.concatenate %84, %85 in 1 : vector<8x255xf32>, vector<8x1xf32> -> vector<8x256xf32>
    %87 = vector.extract_strided_slice %2 {offsets = [5, 0], sizes = [1, 256], strides = [1, 1]} : vector<9x256xf32> to vector<1x256xf32>
    %88 = vector.broadcast %87 : vector<1x256xf32> to vector<8x256xf32>
    %89 = arith.mulf %86, %88 : vector<8x256xf32>
    %90 = vector.extract_strided_slice %59 {offsets = [0, 15], sizes = [8, 241], strides = [1, 1]} : vector<8x256xf32> to vector<8x241xf32>
    %91 = vector.extract_strided_slice %59 {offsets = [0, 0], sizes = [8, 15], strides = [1, 1]} : vector<8x256xf32> to vector<8x15xf32>
    %92 = tpu.concatenate %90, %91 in 1 : vector<8x241xf32>, vector<8x15xf32> -> vector<8x256xf32>
    %93 = vector.extract_strided_slice %2 {offsets = [6, 0], sizes = [1, 256], strides = [1, 1]} : vector<9x256xf32> to vector<1x256xf32>
    %94 = vector.broadcast %93 : vector<1x256xf32> to vector<8x256xf32>
    %95 = arith.mulf %92, %94 : vector<8x256xf32>
    %96 = vector.extract_strided_slice %59 {offsets = [0, 16], sizes = [8, 240], strides = [1, 1]} : vector<8x256xf32> to vector<8x240xf32>
    %97 = vector.extract_strided_slice %59 {offsets = [0, 0], sizes = [8, 16], strides = [1, 1]} : vector<8x256xf32> to vector<8x16xf32>
    %98 = tpu.concatenate %96, %97 in 1 : vector<8x240xf32>, vector<8x16xf32> -> vector<8x256xf32>
    %99 = vector.extract_strided_slice %2 {offsets = [7, 0], sizes = [1, 256], strides = [1, 1]} : vector<9x256xf32> to vector<1x256xf32>
    %100 = vector.broadcast %99 : vector<1x256xf32> to vector<8x256xf32>
    %101 = arith.mulf %98, %100 : vector<8x256xf32>
    %102 = vector.extract_strided_slice %59 {offsets = [0, 17], sizes = [8, 239], strides = [1, 1]} : vector<8x256xf32> to vector<8x239xf32>
    %103 = vector.extract_strided_slice %59 {offsets = [0, 0], sizes = [8, 17], strides = [1, 1]} : vector<8x256xf32> to vector<8x17xf32>
    %104 = tpu.concatenate %102, %103 in 1 : vector<8x239xf32>, vector<8x17xf32> -> vector<8x256xf32>
    %105 = vector.extract_strided_slice %2 {offsets = [8, 0], sizes = [1, 256], strides = [1, 1]} : vector<9x256xf32> to vector<1x256xf32>
    %106 = vector.broadcast %105 : vector<1x256xf32> to vector<8x256xf32>
    %107 = arith.mulf %104, %106 : vector<8x256xf32>
    %108 = tpu.concatenate %65, %71, %77, %83, %59, %89, %95, %101, %107 in 0 : vector<8x256xf32>, vector<8x256xf32>, vector<8x256xf32>, vector<8x256xf32>, vector<8x256xf32>, vector<8x256xf32>, vector<8x256xf32>, vector<8x256xf32>, vector<8x256xf32> -> vector<72x256xf32>
    %109 = arith.truncf %108 : vector<72x256xf32> to vector<72x256xbf16>
    %c0_9 = arith.constant 0 : index
    %c0_10 = arith.constant 0 : index
    %110 = vector.load %arg5[%c0_9, %c0_10] : memref<8x72xbf16, #tpu.memory_space<vmem>>, vector<8x72xbf16>
    %cst_11 = arith.constant dense<0.000000e+00> : vector<8x256xf32>
    %111 = tpu.matmul %110, %109, %cst_11 {dimension_numbers = #tpu.dot_dimension_numbers<[1], [0], [0], [1], [0, 0, 1, 1], [], []>} : vector<8x72xbf16>, vector<72x256xbf16>, vector<8x256xf32> -> vector<8x256xf32>
    %c0_12 = arith.constant 0 : index
    %c0_13 = arith.constant 0 : index
    %112 = vector.load %arg6[%c0_12, %c0_13] : memref<8x1xf32, #tpu.memory_space<vmem>>, vector<8x1xf32>
    %113 = vector.broadcast %112 : vector<8x1xf32> to vector<8x256xf32>
    %114 = arith.addf %111, %113 : vector<8x256xf32>
    %115 = arith.addf %1, %114 : vector<8x256xf32>
    %c0_14 = arith.constant 0 : index
    %c0_15 = arith.constant 0 : index
    %c0_16 = arith.constant 0 : index
    %116 = vector.load %arg7[%c0_14, %c0_15, %c0_16] : memref<1x8x256xf32, #tpu.memory_space<vmem>>, vector<1x8x256xf32>
    %117 = vector.shape_cast %116 : vector<1x8x256xf32> to vector<8x256xf32>
    %118 = vector.shape_cast %115 : vector<8x256xf32> to vector<1x8x256xf32>
    tpu.vector_store %arg7[%c0_14, %c0_15, %c0_16], %118 {strides = array<i32>} : memref<1x8x256xf32, #tpu.memory_space<vmem>>, vector<1x8x256xf32>,
    return
  }
  func.func @transform_0(%arg0: i32) -> (i32, i32, i32) {
    %c0_i32 = arith.constant 0 : i32
    %c0_i32_0 = arith.constant 0 : i32
    %c0_i32_1 = arith.constant 0 : i32
    return %arg0, %c0_i32, %c0_i32_0 : i32, i32, i32
  }
  func.func @transform_1(%arg0: i32) -> (i32, i32) {
    %c0_i32 = arith.constant 0 : i32
    %c0_i32_0 = arith.constant 0 : i32
    %c0_i32_1 = arith.constant 0 : i32
    return %c0_i32, %c0_i32_0 : i32, i32
  }
  func.func @transform_2(%arg0: i32) -> (i32, i32) {
    %c0_i32 = arith.constant 0 : i32
    %c0_i32_0 = arith.constant 0 : i32
    %c0_i32_1 = arith.constant 0 : i32
    return %c0_i32, %c0_i32_0 : i32, i32
  }
  func.func @transform_3(%arg0: i32) -> (i32, i32) {
    %c0_i32 = arith.constant 0 : i32
    %c0_i32_0 = arith.constant 0 : i32
    %c0_i32_1 = arith.constant 0 : i32
    return %c0_i32, %c0_i32_0 : i32, i32
  }
  func.func @transform_4(%arg0: i32) -> (i32, i32) {
    %c0_i32 = arith.constant 0 : i32
    %c0_i32_0 = arith.constant 0 : i32
    %c0_i32_1 = arith.constant 0 : i32
    return %c0_i32, %c0_i32_0 : i32, i32
  }
  func.func @transform_5(%arg0: i32) -> (i32, i32) {
    %c0_i32 = arith.constant 0 : i32
    %c0_i32_0 = arith.constant 0 : i32
    %c0_i32_1 = arith.constant 0 : i32
    return %c0_i32, %c0_i32_0 : i32, i32
  }
  func.func @transform_6(%arg0: i32) -> (i32, i32, i32) {
    %c0_i32 = arith.constant 0 : i32
    %c0_i32_0 = arith.constant 0 : i32
    %c0_i32_1 = arith.constant 0 : i32
    return %arg0, %c0_i32, %c0_i32_0 : i32, i32, i32
  }
}

</mosaic_0001>

<bundles_post_ra>
// kernel: tpu_custom_call.1
= control target key start
LH: loop header
LB: loop body
LE: loop exit
PB: predicated region body
PF: predicated region fallthrough
CT: control target
= control target key end

     0   :  { %11 = vsyncpa [#allocation3], 0  ;;  %s1459_s0 = inlined_call_operand.hbm [shape: f32[2,8,256], index: 0, kind: input, shape index: {}]   ;;  %s1460_s1 = inlined_call_operand.hbm [shape: f32[9,256], index: 1, kind: input, shape index: {}]   ;;  %s1461_s2 = inlined_call_operand.vmem [shape: bf16[8,72], index: 2, kind: input, shape index: {}]   ;;  %s1462_s3 = inlined_call_operand.vmem [shape: f32[8,1], index: 3, kind: input, shape index: {}]   ;;  %s1463_s4 = inlined_call_operand.vmem [shape: bf16[8,72], index: 4, kind: input, shape index: {}]   ;;  %s1464_s5 = inlined_call_operand.vmem [shape: f32[8,1], index: 5, kind: input, shape index: {}]   ;;  %s1465_s6 = inlined_call_operand.hbm [shape: f32[2,8,256], index: 6, kind: output, shape index: {}]  }
   0x1   :  { %13 = vsyncpa [#allocation3 + $0x1], 0 }
   0x2   :  { %14 = vsyncpa [#allocation6], 0 }
   0x3   :  { %15 = vsyncpa [#allocation4], 0 }
   0x4   :  { %17 = vsyncpa [#allocation4 + $0x1], 0  ;;  %s1051_s21 = smov 0   ;;  %s1053_s22 = smov 0  }
   0x5   :  { %s1055_s23 = smov 0   ;;  %s1057_s24 = smov 0  }
   0x6 LB: > { %s1072_s25 = sadd.s32 4294967295, %s1000_s24   ;;  %s779_s26 = sadd.s32 4294967294, %s1000_s24   ;;  %s1000_s24 = sphi %s1057_s24, %s1485_s24   ;;  %s996_s23 = sphi %s1055_s23, %s1484_s23   ;;  %s992_s22 = sphi %s1053_s22, %s1483_s22   ;;  %s988_s21 = sphi %s1051_s21, %s1482_s21  }
   0x7   : > { %p43_p0 = scmp.ne.s32.totalorder %s992_s22, %s988_s21  ;;  %p1466_p1 = scmp.eq.s32.totalorder %s1072_s25, 0 }
   0x8   : > { %p178_p3 = scmp.eq.s32.totalorder %s779_s26, 1  ;;  %p780_p5 = scmp.ge.s32.totalorder %s1000_s24, 1 }
   0x9   : > { %p1081_p4 = por %p1466_p1, %p43_p0  ;;  %p185_p7 = scmp.lt.s32.totalorder %s1000_s24, 3 }
   0xa   : > { %p1086_p6 = por %p178_p3, %p43_p0  ;;  %s1002_s30 = smov [#allocation5]  }
   0xb   : > { %s1469_s27 = scalar_select %p1081_p4, 1, 0 }
   0xc   : > { %s1470_s28 = scalar_select %p1086_p6, 1, 0 }
   0xd   : > { %p1091_p8 = pnand %p780_p5, %p185_p7  ;;  %s197_s7 = sshll.u32 %s1002_s30, 4  ;;  %s1095_s7 = int_to_ptr.vmem [resolvable:$true] %s197_s7 }
   0xe   : > { %s1107_s9 = sadd.s32 1, %s1000_s24   ;;  %s30_s10 = sadd.s32 1, %s996_s23 }
   0xf   : > { %s1471_s29 = scalar_select %p1091_p8, 1, 0 }
  0x10   : > { %p811_p9 = pneg %p1091_p8  ;;  %s27_s11 = ssub.s32 %s1000_s24, %s1107_s9 }
  0x11   : > { %s872_s14 = scalar_lea.hbm %s1460_s1, 512 }
  0x12   : > { %p1102_p11 = pnand %p811_p9, %p1466_p1  ;;  %p873_p12 = scmp.ne.s32.totalorder %s1460_s1, %s872_s14 }
  0x13   : > { %p879_p5 = scmp.lt.u32.totalorder %s872_s14, %s1460_s1 }
  0x14   : > { %p874_p13 = pneg %p1102_p11 }
  0x16   : > { %p875_p0 = pnand %p874_p13, %p873_p12 }
  0x18   : > { %p876_p3 = pneg %p875_p0 }
  0x1a   : > { %p881_p7 = pnand %p879_p5, %p876_p3 }
  0x1c   : > { %884 = shalt.err (!%p881_p7)
}
  0x1d   : > { %s885_s19 = scalar_lea.vmem %s1095_s7, 512  ;;  %p893_p2 = scmp.lt.s32.totalorder %s1095_s7, %s1095_s7 }
  0x1e   : > { %p886_p9 = scmp.ne.s32.totalorder %s1095_s7, %s885_s19  ;;  %p894_p6 = scmp.lt.s32.totalorder %s885_s19, %s885_s19 }
  0x20   : > { %p888_p10 = pnand %p886_p9, %p874_p13  ;;  %p895_p4 = por %p894_p6, %p893_p2 }
  0x22   : > { %p889_p1 = pneg %p888_p10 }
  0x24   : > { %p896_p8 = pnand %p895_p4, %p889_p1 }
  0x26   : > { %899 = shalt.err (!%p896_p8)
}
  0x27   : > { %s1003_s20 = smov 256   ;;  %s1004_s26 = smov 16  }
  0x28   : > { %814 = dma.hbm_to_vmem [thread:$0]  (!%p1102_p11), %s1460_s1, 512, %s1095_s7, [#allocation6], %s1003_s20, %s1003_s20, %s1004_s26  }
  0x29   : > { %p28_p2 = scmp.eq.s32.totalorder %s27_s11, 0  ;;  %p37_p1 = scmp.ne.s32.totalorder %s996_s23, %s992_s22 }
  0x2a   : > { %p38_p4 = scmp.eq.s32.totalorder %s1000_s24, 0  ;;  %p824_p6 = scmp.lt.s32.totalorder %s1000_s24, 2 }
  0x2b   : > { %s1138_s13 = scalar_select %p28_p2, %s996_s23, %s30_s10  }
  0x2c   : > { %p39_p8 = por %p38_p4, %p37_p1  ;;  %p1473_p10 = scmp.eq.s32.totalorder %s1072_s25, 1 }
  0x2d   : > { %s223_s15 = sand.u32 1, %s996_s23   ;;  %s801_s16 = sshll.u32 %s1000_s24, 8 }
  0x2e   : > { %p1142_p12 = por %p1473_p10, %p37_p1  ;;  %s783_s17 = sshll.u32 %s223_s15, 4 }
  0x2f   : > { %s1151_s19 = scalar_lea.hbm %s1459_s0, %s801_s16  ;;  %s227_s7 = scalar_lea.vmem [#allocation2], %s783_s17 }
  0x30   : > { %s235_s10 = sshll.u32 %s227_s7, 4  ;;  %p1153_p11 = pnand %p824_p6, %p39_p8  ;;  %s1157_s10 = int_to_ptr.vmem [resolvable:$true] %s235_s10 }
  0x31   : > { %s224_s20 = scalar_lea.sflag [#allocation3], %s223_s15  ;;  %s900_s26 = scalar_lea.hbm %s1151_s19, 256 }
  0x32   : > { %p901_p13 = scmp.ne.s32.totalorder %s1151_s19, %s900_s26  ;;  %p902_p0 = pneg %p1153_p11 }
  0x33   : > { %s905_s16 = scalar_lea.hbm %s1459_s0, 512  ;;  %p906_p7 = scmp.lt.u32.totalorder %s1151_s19, %s1459_s0 }
  0x34   : > { %p903_p3 = pnand %p902_p0, %p901_p13  ;;  %p907_p9 = scmp.lt.u32.totalorder %s905_s16, %s900_s26 }
  0x35   : > { %p909_p1 = scmp.lt.u32.totalorder %s900_s26, %s1151_s19 }
  0x36   : > { %p904_p5 = pneg %p903_p3  ;;  %p908_p2 = por %p907_p9, %p906_p7 }
  0x38   : > { %p910_p4 = por %p909_p1, %p908_p2 }
  0x3a   : > { %p911_p6 = pnand %p910_p4, %p904_p5 }
  0x3c   : > { %914 = shalt.err (!%p911_p6)
}
  0x3d   : > { %s915_s15 = scalar_lea.vmem %s1157_s10, 256  ;;  %s1005_s18 = smov [#allocation2]  }
  0x3e   : > { %p916_p8 = scmp.ne.s32.totalorder %s1157_s10, %s915_s15  ;;  %s920_s7 = sshll.u32 %s1005_s18, 4  ;;  %s921_s7 = int_to_ptr.vmem [resolvable:$false] %s920_s7 }
  0x3f   : > { %s922_s30 = scalar_lea.vmem %s921_s7, 512  ;;  %p923_p3 = scmp.lt.s32.totalorder %s1157_s10, %s921_s7 }
  0x40   : > { %p918_p10 = pnand %p916_p8, %p902_p0  ;;  %p924_p7 = scmp.lt.s32.totalorder %s922_s30, %s915_s15 }
  0x42   : > { %p919_p13 = pneg %p918_p10  ;;  %p925_p9 = por %p924_p7, %p923_p3 }
  0x44   : > { %p926_p2 = pnand %p925_p9, %p919_p13 }
  0x46   : > { %929 = shalt.err (!%p926_p2)
}
  0x47   : > { %818 = dma.hbm_to_vmem [thread:$0]  (!%p1153_p11), %s1151_s19, 256, %s1157_s10, %s224_s20  }
  0x48   : > { %p1476_p5 = scmp.ne.s32.totalorder %s1471_s29, 0 }
  0x49   : > { %s1187_s26 = sand.u32 (!%p1476_p5), 1, %s992_s22   ;;  %p1477_p0 = scmp.ne.s32.totalorder (!%p1476_p5), %s1469_s27, 0 }
  0x4a   : > { %244 = sbr.rel (%p1476_p5) target bundleno = 841 (0x349), region = 44  ;;  %s787_s12 = sshll.u32 (!%p1476_p5), %s1187_s26, 4 }
  0x4b   : > { %s247_s16 = scalar_lea.sflag (!%p1476_p5), [#allocation3], %s1187_s26  ;;  %s250_s17 = scalar_lea.vmem (!%p1476_p5), [#allocation2], %s787_s12 }
  0x51   : > { %975 = dma.done.wait (%p1477_p0), %s247_s16, 256  }
  0x52   : > { %977 = vsyncadd (%p1477_p0), %s247_s16, 4294967040  ;;  %p1478_p11 = scmp.eq.s32.totalorder %s1072_s25, 0 }
  0x54   : > { %979 = dma.done.wait (%p1478_p11), [#allocation6], 512   ;;  %p1479_p1 = pmov %p1478_p11 }
  0x55   : > { %v1201_v0 = vld [vmem:[%s250_s17 + $0x8] sm:$0xff]  ;;  %s1006_s29 = smov 16   ;;  %s1007_s19 = smov 17   ;;  %v1207_v1 = vld [vmem:[%s250_s17] sm:$0xff]  ;;  %v1012_v2 = vmov 0   ;;  %v302_v4 = vlaneseq  ;;  %vm317_vm0 = vcmask 130048  }
  0x56   : > { %981 = vsyncadd (%p1479_p1), [#allocation6], 4294966784  ;;  %312 = vrot.lane.b32.xlu1 %v1201_v0, %s1006_s29  ;;  %291 = vrot.lane.b32.xlu0 %v1201_v0, %s1007_s19  ;;  %s1008_s27 = smov 15   ;;  %s1009_s10 = smov 1   ;;  %v463_v3 = vld [vmem:[%s1462_s3] sm:$0xff]  ;;  %v1246_v9 = vld [vmem:[#allocation5 + $0x8] sm:$0xff] }
  0x57   : > { %s1010_s11 = smov 127   ;;  %s1011_s20 = smov 113   ;;  %512 = vmatprep.mubr.bf16.mxu0 %v1012_v2  ;;  %871 = vset.pattern.permute.xlu0 %v1012_v2  ;;  %v1240_v5 = vshrl.u32 %v302_v4, 7  ;;  %v1244_v8 = vld [vmem:[#allocation5] sm:$0xff]  ;;  %vm297_vm1 = vcmask 138240   ;;  %vm337_vm2 = vcmask 121856  }
  0x58   : > { %671 = vmatprep.mubr.bf16.mxu1 %v1012_v2  ;;  %s1013_s8 = smov 112   ;;  %s1014_s15 = smov 111   ;;  %vm357_vm3 = vcmask 7168   ;;  %vm376_vm4 = vcmask 1039360   ;;  %vm396_vm5 = vcmask 924672   ;;  %vm416_vm6 = vcmask 916480  }
  0x59   : > { %v324_v6 = vsub.s32 1, %v1240_v5  ;;  %v304_v7 = vsub.s32 0, %v1240_v5  ;;  %v344_v18 = vsub.s32 2, %v1240_v5  ;;  %v364_v19 = vsub.s32 3, %v1240_v5  ;;  %s1015_s7 = smov [#allocation7]  }
  0x5a   : > { %315 = vrot.lane.b32.xlu1 %v1207_v1, %s1006_s29  ;;  %295 = vrot.lane.b32.xlu0 %v1207_v1, %s1007_s19  ;;  %v384_v32 = vsub.s32 5, %v1240_v5  ;;  %v404_v55 = vsub.s32 6, %v1240_v5  ;;  %v424_v58 = vsub.s32 7, %v1240_v5  ;;  %vm436_vm7 = vcmask 908288   ;;  %s934_s30 = sshll.u32 %s1015_s7, 4  ;;  %s935_s30 = int_to_ptr.vmem [resolvable:$false] %s934_s30 }
  0x5b   : > { %v1249_v12 = vrot.slane %v1244_v8, %v324_v6  ;;  %v1252_v13 = vrot.slane %v1244_v8, %v304_v7  ;;  %v1255_v14 = vrot.slane %v1246_v9, %v304_v7  ;;  %v1258_v15 = vrot.slane %v1246_v9, %v324_v6  ;;  %s936_s16 = scalar_lea.vmem %s935_s30, 512 }
  0x5c   : > { %v1272_v33 = vrot.slane %v1244_v8, %v344_v18  ;;  %v1275_v34 = vrot.slane %v1246_v9, %v344_v18  ;;  %v1278_v35 = vrot.slane %v1244_v8, %v364_v19  ;;  %v1281_v36 = vrot.slane %v1246_v9, %v364_v19  ;;  %v1325_v19 = vld [vmem:[#allocation5 + $0x10] ss:$0 sm:$0xff] }
  0x5d   : > { %v1288_v43 = vrot.slane %v1244_v8, %v384_v32  ;;  %v1291_v44 = vrot.slane %v1246_v9, %v384_v32  ;;  %v1306_v63 = vrot.slane %v1244_v8, %v404_v55  ;;  %v1309_v2 = vrot.slane %v1246_v9, %v404_v55  ;;  %v462_v32 = vld [vmem:[%s1461_s2] sm:$0xf] }
  0x5e   : > { %335 = vrot.lane.b32.xlu1 %v1207_v1, %s1008_s27  ;;  %332 = vrot.lane.b32.xlu0 %v1201_v0, %s1008_s27  ;;  %v1315_v4 = vrot.slane %v1246_v9, %v424_v58  ;;  %vm473_vm8 = vcmask 1043456   ;;  %vm469_vm9 = vcmask 588800  }
  0x62   : > { %355 = vrot.lane.b32.xlu1 %v1207_v1, %s1009_s10  ;;  %352 = vrot.lane.b32.xlu0 %v1201_v0, %s1009_s10 }
  0x66   : > { %374 = vrot.lane.b32.xlu1 %v1201_v0, %s1010_s11  ;;  %372 = vrot.lane.b32.xlu0 %v1207_v1, %s1010_s11 }
  0x6a   : > { %394 = vrot.lane.b32.xlu1 %v1201_v0, %s1011_s20  ;;  %392 = vrot.lane.b32.xlu0 %v1207_v1, %s1011_s20 }
  0x6e   : > { %414 = vrot.lane.b32.xlu1 %v1201_v0, %s1013_s8  ;;  %412 = vrot.lane.b32.xlu0 %v1207_v1, %s1013_s8 }
  0x72   : > { %434 = vrot.lane.b32.xlu1 %v1201_v0, %s1014_s15  ;;  %432 = vrot.lane.b32.xlu0 %v1207_v1, %s1014_s15 }
  0x76   : > { %466 = vperm.xlu0 %871, %v463_v3   ;;  %v1312_v3 = vrot.slane %v1244_v8, %v424_v58 }
  0xc8   : > { %v313_v10 = vpop.permute.xlu1 %312  ;;  %v292_v11 = vpop.permute.xlu0 %291 }
  0xcc   : > { %v316_v16 = vpop.permute.xlu1 %315  ;;  %v296_v17 = vpop.permute.xlu0 %295 }
  0xcd   : > { %v318_v20 = vsel %vm317_vm0, %v316_v16, %v313_v10  ;;  %v321_v21 = vsel %vm317_vm0, %v313_v10, %v316_v16  ;;  %v298_v22 = vsel %vm297_vm1, %v296_v17, %v292_v11  ;;  %v301_v23 = vsel %vm297_vm1, %v292_v11, %v296_v17 }
  0xce   : > { %v330_v24 = vmul.f32 %v1249_v12, %v321_v21  ;;  %v310_v25 = vmul.f32 %v1252_v13, %v301_v23  ;;  %v311_v26 = vmul.f32 %v1255_v14, %v298_v22  ;;  %v331_v27 = vmul.f32 %v1258_v15, %v318_v20  ;;  %v1327_v20 = vld [vmem:[#allocation5 + $0x18] ss:$0 sm:$0xff] }
  0xd0   : > { %v336_v28 = vpop.permute.xlu1 %335  ;;  %v333_v29 = vpop.permute.xlu0 %332  ;;  %v453_v30 = vpack.c.bf16 %v331_v27, %v311_v26  ;;  %v452_v31 = vpack.c.bf16 %v330_v24, %v310_v25 }
  0xd1   : > { %v338_v37 = vsel %vm337_vm2, %v336_v28, %v333_v29  ;;  %v341_v38 = vsel %vm337_vm2, %v333_v29, %v336_v28 }
  0xd2   : > { %480 = vmatprep.subr.bf16.mxu0 %v453_v30  ;;  %v350_v45 = vmul.f32 %v1272_v33, %v341_v38  ;;  %v351_v46 = vmul.f32 %v1275_v34, %v338_v37 }
  0xd3   : > { %481 = vmatpush1.bf16.msra.mxu0 %v452_v31 }
  0xd4   : > { %v356_v39 = vpop.permute.xlu1 %355  ;;  %v353_v40 = vpop.permute.xlu0 %352 }
  0xd5   : > { %v358_v41 = vsel %vm357_vm3, %v356_v39, %v353_v40  ;;  %v361_v42 = vsel %vm357_vm3, %v353_v40, %v356_v39 }
  0xd6   : > { %v370_v47 = vmul.f32 %v1278_v35, %v361_v42  ;;  %v371_v48 = vmul.f32 %v1281_v36, %v358_v41 }
  0xd8   : > { %v375_v49 = vpop.permute.xlu1 %374  ;;  %v373_v50 = vpop.permute.xlu0 %372  ;;  %v455_v51 = vpack.c.bf16 %v371_v48, %v351_v46  ;;  %v454_v52 = vpack.c.bf16 %v370_v47, %v350_v45  ;;  %v624_v48 = vld [vmem:[%s1464_s5] sm:$0xff] }
  0xd9   : > { %v377_v53 = vsel %vm376_vm4, %v373_v50, %v375_v49  ;;  %v381_v54 = vsel %vm376_vm4, %v375_v49, %v373_v50 }
  0xda   : > { %v390_v56 = vmul.f32 %v1288_v43, %v377_v53  ;;  %v391_v57 = vmul.f32 %v1291_v44, %v381_v54  ;;  %482 = vmatprep.subr.bf16.mxu0 %v455_v51 }
  0xdb   : > { %483 = vmatpush1.bf16.msra.mxu0 %v454_v52 }
  0xdc   : > { %v395_v59 = vpop.permute.xlu1 %394  ;;  %v393_v60 = vpop.permute.xlu0 %392  ;;  %v457_v61 = vpack.c.bf16 %v391_v57, %v1201_v0  ;;  %v456_v62 = vpack.c.bf16 %v390_v56, %v1207_v1 }
  0xdd   : > { %v397_v5 = vsel %vm396_vm5, %v393_v60, %v395_v59  ;;  %v401_v6 = vsel %vm396_vm5, %v395_v59, %v393_v60 }
  0xde   : > { %484 = vmatprep.subr.bf16.mxu0 %v457_v61  ;;  %v410_v17 = vmul.f32 %v1306_v63, %v397_v5  ;;  %v411_v8 = vmul.f32 %v1309_v2, %v401_v6 }
  0xdf   : > { %485 = vmatpush1.bf16.msra.mxu0 %v456_v62 }
  0xe0   : > { %v415_v7 = vpop.permute.xlu1 %414  ;;  %v413_v10 = vpop.permute.xlu0 %412 }
  0xe1   : > { %v417_v11 = vsel %vm416_vm6, %v413_v10, %v415_v7  ;;  %v421_v16 = vsel %vm416_vm6, %v415_v7, %v413_v10 }
  0xe2   : > { %v430_v18 = vmul.f32 %v1312_v3, %v417_v11  ;;  %v431_v9 = vmul.f32 %v1315_v4, %v421_v16 }
  0xe4   : > { %v435_v21 = vpop.permute.xlu1 %434  ;;  %v433_v22 = vpop.permute.xlu0 %432  ;;  %v459_v23 = vpack.c.bf16 %v431_v9, %v411_v8  ;;  %v458_v24 = vpack.c.bf16 %v430_v18, %v410_v17 }
  0xe5   : > { %v437_v25 = vsel %vm436_vm7, %v433_v22, %v435_v21  ;;  %v441_v26 = vsel %vm436_vm7, %v435_v21, %v433_v22 }
  0xe6   : > { %v450_v27 = vmul.f32 %v1325_v19, %v437_v25  ;;  %v451_v28 = vmul.f32 %v1327_v20, %v441_v26  ;;  %486 = vmatprep.subr.bf16.mxu0 %v459_v23 }
  0xe7   : > { %487 = vmatpush1.bf16.msra.mxu0 %v458_v24 }
  0xe8   : > { %v460_v29 = vpack.c.bf16 %v450_v27, %v450_v27  ;;  %v461_v30 = vpack.c.bf16 %v451_v28, %v451_v28 }
  0xea   : > { %792 = vmatprep.subr.msk.bf16.mxu0 %vm473_vm8, %v461_v30  ;;  %v475_v31 = vsel %vm473_vm8, %v460_v29, 0 }
  0xeb   : > { %489 = vmatpush1.bf16.msra.mxu0 %v475_v31 }
  0xee   : > { %793 = vmatmul.mubr.msk.bf16.vlgmr.msra.gmra.mrb[0].mxu0 %vm469_vm9, %v462_v32 }
  0xf5   : > { %v467_v37 = vpop.permute.xlu0 %466 }
 0x1c1   : > { %v514_v38 = vpop.f32.mrb[0].mxu0 }
 0x1c2   : > { %v515_v39 = vadd.f32 %v514_v38, %v467_v37  ;;  %v516_v40 = vpop.f32.mrb[1].mxu0 }
 0x1c3   : > { %v518_v41 = vpop.f32.mrb[2].mxu0  ;;  %v517_v45 = vadd.f32 %v516_v40, %v467_v37 }
 0x1c4   : > { %v1339_v42 = vmax.f32 %v515_v39, 0.0  ;;  %v519_v46 = vpop.f32.mrb[3].mxu0 }
 0x1c5   : > { %v522_v47 = vmax.f32 %v517_v45, 0.0 }
 0x1c6   : > { %569 = vrot.lane.b32.xlu0 %v1339_v42, %s1010_s11  ;;  %528 = vrot.lane.b32.xlu1 %v1339_v42, %s1007_s19 }
 0x1ca   : > { %536 = vrot.lane.b32.xlu0 %v522_v47, %s1006_s29  ;;  %539 = vrot.lane.b32.xlu1 %v1339_v42, %s1006_s29 }
 0x1ce   : > { %547 = vrot.lane.b32.xlu0 %v522_v47, %s1008_s27  ;;  %550 = vrot.lane.b32.xlu1 %v1339_v42, %s1008_s27 }
 0x1d2   : > { %558 = vrot.lane.b32.xlu0 %v522_v47, %s1009_s10  ;;  %561 = vrot.lane.b32.xlu1 %v1339_v42, %s1009_s10  ;;  %s802_s10 = sshll.u32 %s1072_s25, 8  ;;  %s685_s25 = scalar_lea.sflag [#allocation4], %s1187_s26 }
 0x1d3   : > { %s1415_s18 = scalar_lea.hbm %s1465_s6, %s802_s10 }
 0x1d6   : > { %580 = vrot.lane.b32.xlu0 %v1339_v42, %s1011_s20  ;;  %524 = vrot.lane.b32.xlu1 %v522_v47, %s1007_s19 }
 0x1da   : > { %591 = vrot.lane.b32.xlu0 %v1339_v42, %s1013_s8  ;;  %571 = vrot.lane.b32.xlu1 %v522_v47, %s1010_s11  ;;  %s282_s11 = scalar_lea.vmem [#allocation7], %s787_s12 }
 0x1de   : > { %602 = vrot.lane.b32.xlu0 %v1339_v42, %s1014_s15  ;;  %582 = vrot.lane.b32.xlu1 %v522_v47, %s1011_s20  ;;  %s699_s20 = sshll.u32 %s282_s11, 4  ;;  %s1417_s20 = int_to_ptr.vmem [resolvable:$true] %s699_s20 }
 0x1df   : > { %s930_s12 = scalar_lea.vmem %s1417_s20, 256  ;;  %p937_p10 = scmp.lt.s32.totalorder %s1417_s20, %s935_s30 }
 0x1e0   : > { %p931_p4 = scmp.ne.s32.totalorder %s1417_s20, %s930_s12  ;;  %p938_p13 = scmp.lt.s32.totalorder %s936_s16, %s930_s12 }
 0x1e2   : > { %627 = vperm.xlu0 %871, %v624_v48   ;;  %593 = vrot.lane.b32.xlu1 %v522_v47, %s1013_s8  ;;  %v623_v48 = vld [vmem:[%s1463_s4] sm:$0xf]  ;;  %p932_p6 = pnand %p931_p4, %p1142_p12  ;;  %p939_p3 = por %p938_p13, %p937_p10 }
 0x1e4   : > { %p933_p8 = pneg %p932_p6 }
 0x1e6   : > { %604 = vrot.lane.b32.xlu1 %v522_v47, %s1014_s15  ;;  %p940_p7 = pnand %p939_p3, %p933_p8 }
 0x238   : > { %v570_v49 = vpop.permute.xlu0 %569  ;;  %v529_v50 = vpop.permute.xlu1 %528 }
 0x23c   : > { %v537_v51 = vpop.permute.xlu0 %536  ;;  %v540_v52 = vpop.permute.xlu1 %539 }
 0x23d   : > { %v544_v57 = vsel %vm317_vm0, %v537_v51, %v540_v52  ;;  %v541_v58 = vsel %vm317_vm0, %v540_v52, %v537_v51 }
 0x23e   : > { %v545_v60 = vmul.f32 %v544_v57, %v1249_v12  ;;  %v546_v7 = vmul.f32 %v541_v58, %v1258_v15 }
 0x240   : > { %v548_v53 = vpop.permute.xlu0 %547  ;;  %v551_v54 = vpop.permute.xlu1 %550 }
 0x241   : > { %v552_v62 = vsel %vm337_vm2, %v551_v54, %v548_v53  ;;  %v555_v8 = vsel %vm337_vm2, %v548_v53, %v551_v54 }
 0x242   : > { %v557_v12 = vmul.f32 %v552_v62, %v1275_v34 }
 0x244   : > { %v559_v55 = vpop.permute.xlu0 %558  ;;  %v562_v56 = vpop.permute.xlu1 %561 }
 0x245   : > { %v563_v59 = vsel %vm357_vm3, %v562_v56, %v559_v55  ;;  %v566_v10 = vsel %vm357_vm3, %v559_v55, %v562_v56 }
 0x246   : > { %v568_v11 = vmul.f32 %v563_v59, %v1281_v36  ;;  %v567_v23 = vmul.f32 %v566_v10, %v1278_v35 }
 0x248   : > { %v525_v61 = vpop.permute.xlu1 %524  ;;  %v581_v18 = vpop.permute.xlu0 %580 }
 0x249   : > { %v530_v5 = vsel %vm297_vm1, %v529_v50, %v525_v61  ;;  %v533_v6 = vsel %vm297_vm1, %v525_v61, %v529_v50 }
 0x24a   : > { %v534_v16 = vmul.f32 %v533_v6, %v1252_v13  ;;  %v535_v17 = vmul.f32 %v530_v5, %v1255_v14  ;;  %v616_v13 = vpack.c.bf16 %v568_v11, %v557_v12  ;;  %v556_v14 = vmul.f32 %v555_v8, %v1272_v33 }
 0x24c   : > { %v572_v9 = vpop.permute.xlu1 %571  ;;  %v614_v21 = vpack.c.bf16 %v546_v7, %v535_v17  ;;  %v613_v22 = vpack.c.bf16 %v545_v60, %v534_v16  ;;  %v615_v26 = vpack.c.bf16 %v567_v23, %v556_v14  ;;  %v592_v27 = vpop.permute.xlu0 %591 }
 0x24d   : > { %v577_v15 = vsel %vm376_vm4, %v572_v9, %v570_v49  ;;  %v573_v24 = vsel %vm376_vm4, %v570_v49, %v572_v9 }
 0x24e   : > { %v579_v36 = vmul.f32 %v577_v15, %v1291_v44  ;;  %639 = vmatprep.subr.bf16.mxu1 %v614_v21  ;;  %v578_v34 = vmul.f32 %v573_v24, %v1288_v43 }
 0x24f   : > { %640 = vmatpush1.bf16.msra.mxu1 %v613_v22 }
 0x250   : > { %641 = vmatprep.subr.bf16.mxu1 %v616_v13  ;;  %v583_v25 = vpop.permute.xlu1 %582  ;;  %v618_v28 = vpack.c.bf16 %v579_v36, %v522_v47  ;;  %v617_v33 = vpack.c.bf16 %v578_v34, %v1339_v42  ;;  %v603_v39 = vpop.permute.xlu0 %602 }
 0x251   : > { %v584_v35 = vsel %vm396_vm5, %v581_v18, %v583_v25  ;;  %v588_v29 = vsel %vm396_vm5, %v583_v25, %v581_v18 }
 0x252   : > { %v589_v32 = vmul.f32 %v584_v35, %v1306_v63  ;;  %v590_v43 = vmul.f32 %v588_v29, %v1309_v2 }
 0x253   : > { %642 = vmatpush1.bf16.msra.mxu1 %v615_v26 }
 0x254   : > { %643 = vmatprep.subr.bf16.mxu1 %v618_v28  ;;  %v594_v30 = vpop.permute.xlu1 %593 }
 0x255   : > { %v595_v44 = vsel %vm416_vm6, %v592_v27, %v594_v30  ;;  %v599_v31 = vsel %vm416_vm6, %v594_v30, %v592_v27 }
 0x256   : > { %v600_v37 = vmul.f32 %v595_v44, %v1312_v3  ;;  %v601_v38 = vmul.f32 %v599_v31, %v1315_v4 }
 0x257   : > { %644 = vmatpush1.bf16.msra.mxu1 %v617_v33 }
 0x258   : > { %v605_v40 = vpop.permute.xlu1 %604  ;;  %v620_v41 = vpack.c.bf16 %v601_v38, %v590_v43  ;;  %v619_v45 = vpack.c.bf16 %v600_v37, %v589_v32 }
 0x259   : > { %v606_v46 = vsel %vm436_vm7, %v603_v39, %v605_v40  ;;  %v610_v47 = vsel %vm436_vm7, %v605_v40, %v603_v39 }
 0x25a   : > { %v611_v42 = vmul.f32 %v1325_v19, %v606_v46  ;;  %v612_v63 = vmul.f32 %v1327_v20, %v610_v47  ;;  %645 = vmatprep.subr.bf16.mxu1 %v620_v41 }
 0x25b   : > { %646 = vmatpush1.bf16.msra.mxu1 %v619_v45 }
 0x25c   : > { %v621_v2 = vpack.c.bf16 %v611_v42, %v611_v42  ;;  %v622_v3 = vpack.c.bf16 %v612_v63, %v612_v63 }
 0x25e   : > { %794 = vmatprep.subr.msk.bf16.mxu1 %vm473_vm8, %v622_v3  ;;  %v634_v4 = vsel %vm473_vm8, %v621_v2, 0 }
 0x25f   : > { %648 = vmatpush1.bf16.msra.mxu1 %v634_v4 }
 0x261   : > { %v628_v49 = vpop.permute.xlu0 %627 }
 0x262   : > { %795 = vmatmul.mubr.msk.bf16.vlgmr.msra.gmra.mrb[0].mxu1 %vm469_vm9, %v623_v48 }
 0x335   : > { %v673_v19 = vpop.f32.mrb[0].mxu1 }
 0x336   : > { %v674_v50 = vadd.f32 %v673_v19, %v628_v49  ;;  %v675_v20 = vpop.f32.mrb[1].mxu1 }
 0x337   : > { %v676_v51 = vadd.f32 %v675_v20, %v628_v49  ;;  %v677_v52 = vpop.f32.mrb[2].mxu1 }
 0x338   : > { %v680_v53 = vadd.f32 %v674_v50, %v1207_v1  ;;  %v678_v54 = vpop.f32.mrb[3].mxu1 }
 0x339   : > { %v681_v55 = vadd.f32 %v676_v51, %v1201_v0 }
 0x33a   : > { %682 = vst [vmem:[%s282_s11] sm:$0xff] %v680_v53 }
 0x33b   : > { %683 = vst [vmem:[%s282_s11 + $0x8] sm:$0xff] %v681_v55 }
 0x33c   : > { %943 = shalt.err (!%p940_p7)
}
 0x33d   : > { %s944_s26 = scalar_lea.hbm %s1415_s18, 256  ;;  %s948_s19 = scalar_lea.hbm %s1465_s6, 512 }
 0x33e   : > { %p945_p9 = scmp.ne.s32.totalorder %s1415_s18, %s944_s26  ;;  %p949_p0 = scmp.lt.u32.totalorder %s1415_s18, %s1465_s6 }
 0x33f   : > { %p950_p11 = scmp.lt.u32.totalorder %s948_s19, %s944_s26  ;;  %p952_p4 = scmp.lt.u32.totalorder %s944_s26, %s1415_s18 }
 0x340   : > { %p946_p2 = pnand %p945_p9, %p1142_p12 }
 0x341   : > { %p951_p1 = por %p950_p11, %p949_p0 }
 0x342   : > { %p947_p5 = pneg %p946_p2 }
 0x343   : > { %p953_p6 = por %p952_p4, %p951_p1 }
 0x345   : > { %p954_p8 = pnand %p953_p6, %p947_p5 }
 0x347   : > { %957 = shalt.err (!%p954_p8)
}
 0x348   : > { %809 = dma.vmem_to_hbm [thread:$0]  (%p1142_p12), %s1417_s20, 256, %s1415_s18, %s685_s25  }
 0x349 PF: > { %s711_s11 = sand.u32 1, %s988_s21   ;;  %p1480_p10 = scmp.ne.s32.totalorder %s1470_s28, 0 }
 0x34a   : > { %p1481_p13 = scmp.ge.s32.totalorder %s1000_s24, 2  ;;  %s712_s8 = scalar_lea.sflag [#allocation4], %s711_s11 }
 0x34c   : > { %p820_p3 = pnand %p1481_p13, %p1480_p10 }
 0x34e   : > { %983 = dma.done.wait (!%p820_p3), %s712_s8, 256  }
 0x34f   : > { %985 = vsyncadd (!%p820_p3), %s712_s8, 4294967040  ;;  %p20_p7 = scmp.ge.s32.totalorder %s1107_s9, 4   ;;  %s1482_s21 = smov %s992_s22 }
 0x350   : > { %s1483_s22 = smov %s996_s23  ;;  %s1484_s23 = smov %s1138_s13 }
 0x351   : > { %s1485_s24 = smov %s1107_s9  ;;  %22 = sbr.rel (!%p20_p7) target bundleno = 6 (0x6), region = 93 }
 0x358   :  { %717 = vsyncpa [#allocation3], 1 }
 0x359   :  { %719 = vsyncpa [#allocation3 + $0x1], 1 }
 0x35a   :  { %720 = vsyncpa [#allocation6], 1 }
 0x35b   :  { %721 = vsyncpa [#allocation4], 1 }
 0x35c   :  { %723 = vsyncpa [#allocation4 + $0x1], 1 }

</bundles_post_ra>
